<compile_context>
chip_gen: v7x
topology: tpu7x:2x2x1
jax: 0.10.0
libtpu: 0.0.40
codegen_flags: <defaults>
</compile_context>

<pallas_src>
import functools

import jax
import jax.numpy as jnp
from jax import lax
from jax.experimental import pallas as pl
from jax.experimental.pallas import tpu as pltpu


# ----------------------------------------------------------------------------
# Fused kernel: one grid step == one coupling layer applied to one batch tile.
#   h  = LeakyReLU(a @ W1e + b1)      (TB, H)   W1e rows live only on kept lanes
#   h  = LeakyReLU(h @ W2bd + b2)     (TB, H)   block-diagonal (s | t branches)
#   h  = LeakyReLU(h @ W3bd + b3)     (TB, H)
#   st = h @ W4e + b4e                (TB, H)   cols [0:dim]=s_full,
#                                               [dim:2dim]=t_full,
#                                               [2dim]   = per-row log_det
#   a' = exp(s_full) * a + t_full     (kept lanes: s_full=t_full=0 -> a' = a)
# The activation a is resident in VMEM scratch across the K layer steps.
# ----------------------------------------------------------------------------
def _fused_flow_kernel(x_ref, w_ref, b_ref, z_ref, ld_ref, act_ref,
                       *, dim, nh, n_layers):
    H = 2 * nh
    k = pl.program_id(1)              # layer index (inner, "arbitrary" axis)

    @pl.when(k == 0)
    def _init():
        act_ref[...] = x_ref[...]
        ld_ref[...] = jnp.zeros_like(ld_ref)

    a = act_ref[...]                  # (TB, dim) current activation
    b = b_ref[...]                    # (4, H)

    def leaky(h):
        # max(h, 0.2*h) == leaky_relu(h, 0.2): 2 VALU ops instead of 3.
        return jnp.maximum(h, 0.2 * h)

    # Weight slab row layout: [W1e (dim,H) | W2bd (H,H) | W3bd (H,H) | W4e (H,H)]
    # All row offsets (0, dim, dim+H, dim+2H) are multiples of 8 for dim % 8 == 0.
    h = leaky(jnp.dot(a, w_ref[0:dim, :],
                      preferred_element_type=jnp.float32) + b[0:1, :])
    h = leaky(jnp.dot(h, w_ref[dim:dim + H, :],
                      preferred_element_type=jnp.float32) + b[1:2, :])
    h = leaky(jnp.dot(h, w_ref[dim + H:dim + 2 * H, :],
                      preferred_element_type=jnp.float32) + b[2:3, :])
    st = jnp.dot(h, w_ref[dim + 2 * H:dim + 3 * H, :],
                 preferred_element_type=jnp.float32) + b[3:4, :]

    s_full = st[:, :dim]              # zero on kept lanes
    t_full = st[:, dim:2 * dim]       # zero on kept lanes
    ld = st[:, 2 * dim:2 * dim + 1]   # log_det baked into extra W4 column

    # NOTE: jnp.exp(s) is unguarded (overflows to inf for large s), exactly like
    # the PyTorch original.
    z = jnp.exp(s_full) * a + t_full
    act_ref[...] = z                  # carry activation to the next layer

    # Scatter this layer's log_det into lane k of the (TB, K) output tile via a
    # VALU select (no dynamic-lane store, no XLU reduce).
    col = lax.broadcasted_iota(jnp.int32, ld_ref.shape, 1)
    ld_ref[...] = jnp.where(col == k, ld, ld_ref[...])

    @pl.when(k == n_layers - 1)
    def _finalize():
        z_ref[...] = z


# ----------------------------------------------------------------------------
# Wrapper: one pallas_call for the whole K-layer stack.
# ----------------------------------------------------------------------------
@functools.partial(jax.jit, static_argnames=("batch_tile",))
def affine_half_flow_stack_forward(x, w_stack, b_stack, batch_tile=None):
    B, dim = x.shape
    K, R, H = w_stack.shape
    nh = H // 2
    assert R == dim + 3 * H
    assert b_stack.shape == (K, 4, H)

    if batch_tile is None:
        # >=128 rows fills a v5e MXU pass, >=256 fills v6e/v7x; small demo
        # batches use a single full tile.
        batch_tile = B if B <= 256 else 256
    if B % batch_tile != 0:
        batch_tile = B                # fall back to one tile for awkward sizes
    nb = B // batch_tile

    kernel = functools.partial(_fused_flow_kernel, dim=dim, nh=nh, n_layers=K)

    flops = K * (2 * B * (dim * H + 3 * H * H) + 4 * B * dim)
    bytes_accessed = 4 * (x.size + w_stack.size + b_stack.size
                          + B * dim + B * K)

    grid_spec = pltpu.PrefetchScalarGridSpec(
        num_scalar_prefetch=0,
        grid=(nb, K),
        in_specs=[
            pl.BlockSpec((batch_tile, dim), lambda b, k: (b, 0)),
            pl.BlockSpec((None, R, H), lambda b, k: (k, 0, 0)),
            pl.BlockSpec((None, 4, H), lambda b, k: (k, 0, 0)),
        ],
        out_specs=[
            pl.BlockSpec((batch_tile, dim), lambda b, k: (b, 0)),
            pl.BlockSpec((batch_tile, K), lambda b, k: (b, 0)),
        ],
        scratch_shapes=[pltpu.VMEM((batch_tile, dim), jnp.float32)],
    )

    z, ld = pl.pallas_call(
        kernel,
        out_shape=(
            jax.ShapeDtypeStruct((B, dim), jnp.float32),   # final z
            jax.ShapeDtypeStruct((B, K), jnp.float32),     # per-layer log_det
        ),
        grid_spec=grid_spec,
        compiler_params=pltpu.CompilerParams(
            dimension_semantics=("parallel", "arbitrary")),
        cost_estimate=pl.CostEstimate(
            flops=flops, transcendentals=K * B * dim,
            bytes_accessed=bytes_accessed),
    )(x, w_stack, b_stack)
    return z, ld


# ----------------------------------------------------------------------------
# One-time host-side packing of the two 4-layer MLPs (s_cond, t_cond) into a
# single fused weight slab + bias slab per coupling layer.  Even/odd masking,
# parity, and the log-det reduction are all baked into the packing.
# ----------------------------------------------------------------------------
def pack_affine_half_flow_params(s_params, t_params, dim, nh, parity):
    H = 2 * nh
    assert dim % 2 == 0
    assert 2 * dim + 1 <= H, "need lanes for s, t and the log-det column"
    if H > 128:
        # NOTE: the block-diagonal W2/W3 fusion is only free while H fits one
        # MXU tile; for larger nh un-fuse the s/t branches into two matmuls.
        raise NotImplementedError("un-fuse s/t branches for H > 128")

    sw1, sb1, sw2, sb2, sw3, sb3, sw4, sb4 = s_params
    tw1, tb1, tw2, tb2, tw3, tb3, tw4, tb4 = t_params

    kept = jnp.arange(parity, dim, 2)        # lanes left untouched (x0)
    xform = jnp.arange(1 - parity, dim, 2)   # lanes transformed by exp(s)*x + t

    # Layer 1: (dim, H); rows at kept lanes carry [sw1 | tw1], others zero.
    w1e = jnp.zeros((dim, H), jnp.float32).at[kept, :].set(
        jnp.concatenate([sw1, tw1], axis=1))
    b1 = jnp.concatenate([sb1.reshape(-1), tb1.reshape(-1)])

    # Layers 2, 3: block-diagonal (H, H) keeps s/t branches independent.
    def block_diag(a, c):
        z = jnp.zeros((H, H), jnp.float32)
        return z.at[:nh, :nh].set(a).at[nh:, nh:].set(c)

    w2 = block_diag(sw2, tw2)
    b2 = jnp.concatenate([sb2.reshape(-1), tb2.reshape(-1)])
    w3 = block_diag(sw3, tw3)
    b3 = jnp.concatenate([sb3.reshape(-1), tb3.reshape(-1)])

    # Layer 4: (H, H); s cols -> xform lanes [0:dim], t cols -> lanes [dim:2dim],
    # plus an extra column at lane 2*dim whose entries are the row-sums of sw4
    # so that st[:, 2*dim] == sum_j s_j == log_det (no in-kernel reduce needed).
    w4e = jnp.zeros((H, H), jnp.float32)
    w4e = w4e.at[:nh, xform].set(sw4)
    w4e = w4e.at[nh:, dim + xform].set(tw4)
    w4e = w4e.at[:nh, 2 * dim].set(jnp.sum(sw4, axis=1))
    b4e = jnp.zeros((H,), jnp.float32)
    b4e = b4e.at[xform].set(sb4.reshape(-1)).at[dim + xform].set(tb4.reshape(-1))
    b4e = b4e.at[2 * dim].set(jnp.sum(sb4))

    w_packed = jnp.concatenate([w1e, w2, w3, w4e], axis=0)   # (dim + 3H, H)
    b_packed = jnp.stack([b1, b2, b3, b4e], axis=0)          # (4, H)
    return w_packed, b_packed


def pack_flow_stack(layers, dim, nh):
    """layers: list of (s_params, t_params, parity) -> (K,dim+3H,H), (K,4,H)."""
    ws, bs = [], []
    for s_p, t_p, parity in layers:
        w, b = pack_affine_half_flow_params(s_p, t_p, dim, nh, parity)
        ws.append(w)
        bs.append(b)
    return jnp.stack(ws, axis=0), jnp.stack(bs, axis=0)


# ----------------------------------------------------------------------------
# Parameter setup (deterministic, mimics nn.Linear init ranges).
# MLP(nin, nout, nh): weights stored as (in, out) so the kernel does x @ W + b.
# ----------------------------------------------------------------------------
def init_mlp_params(key, nin, nout, nh):
    dims = [(nin, nh), (nh, nh), (nh, nh), (nh, nout)]
    params = []
    for fi, fo in dims:
        kw, kb, key = jax.random.split(key, 3)
        bound = 1.0 / (fi ** 0.5)
        w = jax.random.uniform(kw, (fi, fo), jnp.float32, -bound, bound)
        b = jax.random.uniform(kb, (1, fo), jnp.float32, -bound, bound)
        params += [w, b]
    return params


# ----------------------------------------------------------------------------
# Pure-JAX reference (mirrors the PyTorch module) for correctness check.
# ----------------------------------------------------------------------------
def _mlp_ref(x, params):
    w1, b1, w2, b2, w3, b3, w4, b4 = params
    h = x @ w1 + b1
    h = jnp.where(h > 0, h, 0.2 * h)
    h = h @ w2 + b2
    h = jnp.where(h > 0, h, 0.2 * h)
    h = h @ w3 + b3
    h = jnp.where(h > 0, h, 0.2 * h)
    return h @ w4 + b4


def affine_half_flow_ref(x, s_params, t_params, parity=0):
    B, dim = x.shape
    x0, x1 = x[:, 0::2], x[:, 1::2]
    if parity:
        x0, x1 = x1, x0
    s = _mlp_ref(x0, s_params)
    t = _mlp_ref(x0, t_params)
    z0 = x0
    z1 = jnp.exp(s) * x1 + t
    if parity:
        z0, z1 = z1, z0
    z = jnp.zeros((B, dim), jnp.float32)
    z = z.at[:, 0::2].set(z0).at[:, 1::2].set(z1)
    return z, jnp.sum(s, axis=1)


if __name__ == "__main__":
    B, dim, nh = 8, 8, 24
    d2 = dim // 2

    key = jax.random.PRNGKey(0)
    kx, key = jax.random.split(key)
    x = jax.random.normal(kx, (B, dim), jnp.float32)

    ok = True

    # --- Single coupling layer (original module semantics), both parities ----
    ks, kt, key = jax.random.split(key, 3)
    s_params = init_mlp_params(ks, d2, d2, nh)
    t_params = init_mlp_params(kt, d2, d2, nh)
    for parity in (0, 1):
        w_stack, b_stack = pack_flow_stack([(s_params, t_params, parity)],
                                           dim, nh)
        z, ld = affine_half_flow_stack_forward(x, w_stack, b_stack)
        z, ld = jax.block_until_ready((z, ld))
        z_ref, ld_ref = affine_half_flow_ref(x, s_params, t_params, parity)
        ok &= bool(jnp.allclose(z, z_ref, atol=1e-4, rtol=1e-4))
        ok &= bool(jnp.allclose(ld[:, 0], ld_ref, atol=1e-4, rtol=1e-4))

    # --- Fused stack of K=4 coupling layers (alternating parity) -------------
    K = 4
    layers = []
    for i in range(K):
        ks, kt, key = jax.random.split(key, 3)
        layers.append((init_mlp_params(ks, d2, d2, nh),
                       init_mlp_params(kt, d2, d2, nh), i % 2))
    w_stack, b_stack = pack_flow_stack(layers, dim, nh)
    z, ld = affine_half_flow_stack_forward(x, w_stack, b_stack)
    z, ld = jax.block_until_ready((z, ld))

    z_cur = x
    ld_refs = []
    for s_p, t_p, parity in layers:
        z_cur, ld_k = affine_half_flow_ref(z_cur, s_p, t_p, parity)
        ld_refs.append(ld_k)
    ld_ref = jnp.stack(ld_refs, axis=1)
    ok &= bool(jnp.allclose(z, z_cur, atol=1e-4, rtol=1e-4))
    ok &= bool(jnp.allclose(ld, ld_ref, atol=1e-4, rtol=1e-4))

    # TODO(synk): optional bf16 cast of the packed weight slab / activations for
    # the matmul operands (v6e/v7x) once a looser-precision mode is acceptable.
    print("KERNEL_OK" if ok else "MISMATCH")
</pallas_src>

<mosaic_0001>
module attributes {stable_mosaic.version = 11 : i64} {
  func.func @_fused_flow_kernel(%arg0: i32, %arg1: i32, %arg2: memref<8x8xf32, #tpu.memory_space<vmem>>, %arg3: memref<1x152x48xf32, #tpu.memory_space<vmem>>, %arg4: memref<1x4x48xf32, #tpu.memory_space<vmem>>, %arg5: memref<8x8xf32, #tpu.memory_space<vmem>>, %arg6: memref<8x1xf32, #tpu.memory_space<vmem>>, %arg7: memref<8x8xf32, #tpu.memory_space<vmem>>) attributes {dimension_semantics = [#tpu.dimension_semantics<parallel>, #tpu.dimension_semantics<arbitrary>], iteration_bounds = array<i64: 1, 1>, scalar_prefetch = 0 : i64, scratch_operands = 1 : i64, tpu.core_type = #tpu.core_type<tc>, window_params = [{transform_indices = @transform_0, window_bounds = array<i64: 8, 8>}, {transform_indices = @transform_1, window_bounds = array<i64: 1, 152, 48>}, {transform_indices = @transform_2, window_bounds = array<i64: 1, 4, 48>}, {transform_indices = @transform_3, window_bounds = array<i64: 8, 8>}, {transform_indices = @transform_4, window_bounds = array<i64: 8, 1>}]} {
    %c0_i32 = arith.constant 0 : i32
    %0 = arith.cmpi eq, %arg1, %c0_i32 : i32
    %1 = arith.extui %0 : i1 to i32
    %c0_i32_0 = arith.constant 0 : i32
    %2 = arith.cmpi ne, %1, %c0_i32_0 : i32
    scf.if %2 {
      %c0_28 = arith.constant 0 : index
      %c0_29 = arith.constant 0 : index
      %55 = vector.load %arg2[%c0_28, %c0_29] : memref<8x8xf32, #tpu.memory_space<vmem>>, vector<8x8xf32>
      %c0_30 = arith.constant 0 : index
      %c0_31 = arith.constant 0 : index
      %56 = vector.load %arg7[%c0_30, %c0_31] : memref<8x8xf32, #tpu.memory_space<vmem>>, vector<8x8xf32>
      tpu.vector_store %arg7[%c0_30, %c0_31], %55 {strides = array<i32>} : memref<8x8xf32, #tpu.memory_space<vmem>>, vector<8x8xf32>,
      %cst_32 = arith.constant 0.000000e+00 : f32
      %57 = vector.broadcast %cst_32 : f32 to vector<8x1xf32>
      %c0_33 = arith.constant 0 : index
      %c0_34 = arith.constant 0 : index
      %58 = vector.load %arg6[%c0_33, %c0_34] : memref<8x1xf32, #tpu.memory_space<vmem>>, vector<8x1xf32>
      tpu.vector_store %arg6[%c0_33, %c0_34], %57 {strides = array<i32>} : memref<8x1xf32, #tpu.memory_space<vmem>>, vector<8x1xf32>,
    } else {
    }
    %c0 = arith.constant 0 : index
    %c0_1 = arith.constant 0 : index
    %3 = vector.load %arg7[%c0, %c0_1] : memref<8x8xf32, #tpu.memory_space<vmem>>, vector<8x8xf32>
    %c0_2 = arith.constant 0 : index
    %c0_3 = arith.constant 0 : index
    %c0_4 = arith.constant 0 : index
    %4 = vector.load %arg4[%c0_2, %c0_3, %c0_4] : memref<1x4x48xf32, #tpu.memory_space<vmem>>, vector<1x4x48xf32>
    %5 = vector.shape_cast %4 : vector<1x4x48xf32> to vector<4x48xf32>
    %c0_5 = arith.constant 0 : index
    %c0_6 = arith.constant 0 : index
    %c0_7 = arith.constant 0 : index
    %6 = vector.load %arg3[%c0_5, %c0_6, %c0_7] : memref<1x152x48xf32, #tpu.memory_space<vmem>>, vector<1x8x48xf32>
    %7 = vector.shape_cast %6 : vector<1x8x48xf32> to vector<8x48xf32>
    %cst = arith.constant dense<0.000000e+00> : vector<8x48xf32>
    %8 = tpu.matmul %3, %7, %cst {dimension_numbers = #tpu.dot_dimension_numbers<[1], [0], [0], [1], [0, 0, 1, 1], [], []>} : vector<8x8xf32>, vector<8x48xf32>, vector<8x48xf32> -> vector<8x48xf32>
    %9 = vector.extract_strided_slice %5 {offsets = [0, 0], sizes = [1, 48], strides = [1, 1]} : vector<4x48xf32> to vector<1x48xf32>
    %10 = vector.broadcast %9 : vector<1x48xf32> to vector<8x48xf32>
    %11 = arith.addf %8, %10 : vector<8x48xf32>
    %cst_8 = arith.constant 2.000000e-01 : f32
    %12 = vector.broadcast %cst_8 : f32 to vector<8x48xf32>
    %13 = arith.mulf %12, %11 : vector<8x48xf32>
    %14 = arith.maximumf %11, %13 : vector<8x48xf32>
    %c0_9 = arith.constant 0 : index
    %c8 = arith.constant 8 : index
    %c0_10 = arith.constant 0 : index
    %15 = vector.load %arg3[%c0_9, %c8, %c0_10] : memref<1x152x48xf32, #tpu.memory_space<vmem>>, vector<1x48x48xf32>
    %16 = vector.shape_cast %15 : vector<1x48x48xf32> to vector<48x48xf32>
    %cst_11 = arith.constant dense<0.000000e+00> : vector<8x48xf32>
    %17 = tpu.matmul %14, %16, %cst_11 {dimension_numbers = #tpu.dot_dimension_numbers<[1], [0], [0], [1], [0, 0, 1, 1], [], []>} : vector<8x48xf32>, vector<48x48xf32>, vector<8x48xf32> -> vector<8x48xf32>
    %18 = vector.extract_strided_slice %5 {offsets = [1, 0], sizes = [1, 48], strides = [1, 1]} : vector<4x48xf32> to vector<1x48xf32>
    %19 = vector.broadcast %18 : vector<1x48xf32> to vector<8x48xf32>
    %20 = arith.addf %17, %19 : vector<8x48xf32>
    %cst_12 = arith.constant 2.000000e-01 : f32
    %21 = vector.broadcast %cst_12 : f32 to vector<8x48xf32>
    %22 = arith.mulf %21, %20 : vector<8x48xf32>
    %23 = arith.maximumf %20, %22 : vector<8x48xf32>
    %c0_13 = arith.constant 0 : index
    %c56 = arith.constant 56 : index
    %c0_14 = arith.constant 0 : index
    %24 = vector.load %arg3[%c0_13, %c56, %c0_14] : memref<1x152x48xf32, #tpu.memory_space<vmem>>, vector<1x48x48xf32>
    %25 = vector.shape_cast %24 : vector<1x48x48xf32> to vector<48x48xf32>
    %cst_15 = arith.constant dense<0.000000e+00> : vector<8x48xf32>
    %26 = tpu.matmul %23, %25, %cst_15 {dimension_numbers = #tpu.dot_dimension_numbers<[1], [0], [0], [1], [0, 0, 1, 1], [], []>} : vector<8x48xf32>, vector<48x48xf32>, vector<8x48xf32> -> vector<8x48xf32>
    %27 = vector.extract_strided_slice %5 {offsets = [2, 0], sizes = [1, 48], strides = [1, 1]} : vector<4x48xf32> to vector<1x48xf32>
    %28 = vector.broadcast %27 : vector<1x48xf32> to vector<8x48xf32>
    %29 = arith.addf %26, %28 : vector<8x48xf32>
    %cst_16 = arith.constant 2.000000e-01 : f32
    %30 = vector.broadcast %cst_16 : f32 to vector<8x48xf32>
    %31 = arith.mulf %30, %29 : vector<8x48xf32>
    %32 = arith.maximumf %29, %31 : vector<8x48xf32>
    %c0_17 = arith.constant 0 : index
    %c104 = arith.constant 104 : index
    %c0_18 = arith.constant 0 : index
    %33 = vector.load %arg3[%c0_17, %c104, %c0_18] : memref<1x152x48xf32, #tpu.memory_space<vmem>>, vector<1x48x48xf32>
    %34 = vector.shape_cast %33 : vector<1x48x48xf32> to vector<48x48xf32>
    %cst_19 = arith.constant dense<0.000000e+00> : vector<8x48xf32>
    %35 = tpu.matmul %32, %34, %cst_19 {dimension_numbers = #tpu.dot_dimension_numbers<[1], [0], [0], [1], [0, 0, 1, 1], [], []>} : vector<8x48xf32>, vector<48x48xf32>, vector<8x48xf32> -> vector<8x48xf32>
    %36 = vector.extract_strided_slice %5 {offsets = [3, 0], sizes = [1, 48], strides = [1, 1]} : vector<4x48xf32> to vector<1x48xf32>
    %37 = vector.broadcast %36 : vector<1x48xf32> to vector<8x48xf32>
    %38 = arith.addf %35, %37 : vector<8x48xf32>
    %39 = vector.extract_strided_slice %38 {offsets = [0, 0], sizes = [8, 8], strides = [1, 1]} : vector<8x48xf32> to vector<8x8xf32>
    %40 = vector.extract_strided_slice %38 {offsets = [0, 8], sizes = [8, 8], strides = [1, 1]} : vector<8x48xf32> to vector<8x8xf32>
    %41 = vector.extract_strided_slice %38 {offsets = [0, 16], sizes = [8, 1], strides = [1, 1]} : vector<8x48xf32> to vector<8x1xf32>
    %42 = math.exp %39 : vector<8x8xf32>
    %43 = arith.mulf %42, %3 : vector<8x8xf32>
    %44 = arith.addf %43, %40 : vector<8x8xf32>
    %c0_20 = arith.constant 0 : index
    %c0_21 = arith.constant 0 : index
    %45 = vector.load %arg7[%c0_20, %c0_21] : memref<8x8xf32, #tpu.memory_space<vmem>>, vector<8x8xf32>
    tpu.vector_store %arg7[%c0_20, %c0_21], %44 {strides = array<i32>} : memref<8x8xf32, #tpu.memory_space<vmem>>, vector<8x8xf32>,
    %46 = tpu.iota {dimensions = array<i32: 1>} : vector<8x1xi32>
    %47 = vector.broadcast %arg1 : i32 to vector<8x1xi32>
    %48 = arith.cmpi eq, %46, %47 : vector<8x1xi32>
    %c0_22 = arith.constant 0 : index
    %c0_23 = arith.constant 0 : index
    %49 = vector.load %arg6[%c0_22, %c0_23] : memref<8x1xf32, #tpu.memory_space<vmem>>, vector<8x1xf32>
    %50 = arith.select %48, %41, %49 : vector<8x1xi1>, vector<8x1xf32>
    %c0_24 = arith.constant 0 : index
    %c0_25 = arith.constant 0 : index
    %51 = vector.load %arg6[%c0_24, %c0_25] : memref<8x1xf32, #tpu.memory_space<vmem>>, vector<8x1xf32>
    tpu.vector_store %arg6[%c0_24, %c0_25], %50 {strides = array<i32>} : memref<8x1xf32, #tpu.memory_space<vmem>>, vector<8x1xf32>,
    %c0_i32_26 = arith.constant 0 : i32
    %52 = arith.cmpi eq, %arg1, %c0_i32_26 : i32
    %53 = arith.extui %52 : i1 to i32
    %c0_i32_27 = arith.constant 0 : i32
    %54 = arith.cmpi ne, %53, %c0_i32_27 : i32
    scf.if %54 {
      %c0_28 = arith.constant 0 : index
      %c0_29 = arith.constant 0 : index
      %55 = vector.load %arg5[%c0_28, %c0_29] : memref<8x8xf32, #tpu.memory_space<vmem>>, vector<8x8xf32>
      tpu.vector_store %arg5[%c0_28, %c0_29], %44 {strides = array<i32>} : memref<8x8xf32, #tpu.memory_space<vmem>>, vector<8x8xf32>,
    } else {
    }
    return
  }
  func.func @transform_0(%arg0: i32, %arg1: i32) -> (i32, i32) {
    %c0_i32 = arith.constant 0 : i32
    %c0_i32_0 = arith.constant 0 : i32
    return %arg0, %c0_i32 : i32, i32
  }
  func.func @transform_1(%arg0: i32, %arg1: i32) -> (i32, i32, i32) {
    %c0_i32 = arith.constant 0 : i32
    %c0_i32_0 = arith.constant 0 : i32
    %c0_i32_1 = arith.constant 0 : i32
    return %arg1, %c0_i32, %c0_i32_0 : i32, i32, i32
  }
  func.func @transform_2(%arg0: i32, %arg1: i32) -> (i32, i32, i32) {
    %c0_i32 = arith.constant 0 : i32
    %c0_i32_0 = arith.constant 0 : i32
    %c0_i32_1 = arith.constant 0 : i32
    return %arg1, %c0_i32, %c0_i32_0 : i32, i32, i32
  }
  func.func @transform_3(%arg0: i32, %arg1: i32) -> (i32, i32) {
    %c0_i32 = arith.constant 0 : i32
    %c0_i32_0 = arith.constant 0 : i32
    return %arg0, %c0_i32 : i32, i32
  }
  func.func @transform_4(%arg0: i32, %arg1: i32) -> (i32, i32) {
    %c0_i32 = arith.constant 0 : i32
    %c0_i32_0 = arith.constant 0 : i32
    return %arg0, %c0_i32 : i32, i32
  }
}

</mosaic_0001>

<bundles_post_ra>
// kernel: affine_half_flow_stack_forward.1
= control target key start
LH: loop header
LB: loop body
LE: loop exit
PB: predicated region body
PF: predicated region fallthrough
CT: control target
= control target key end

     0   :  { %vm22_vm0 = vcmask 64512   ;;  %v541_v2 = vmov 0.0   ;;  %vm542_vm1 = vmmov 0   ;;  %v543_v5 = vmov 0.0|0.0   ;;  %s691_s0 = inlined_call_operand.vmem [shape: f32[8,8], index: 0, kind: input, shape index: {}]   ;;  %s692_s1 = inlined_call_operand.vmem [shape: f32[1,152,48], index: 1, kind: input, shape index: {}]   ;;  %s693_s2 = inlined_call_operand.vmem [shape: f32[1,4,48], index: 2, kind: input, shape index: {}]   ;;  %s694_s3 = inlined_call_operand.hbm [shape: f32[8,8], index: 3, kind: output, shape index: {0}]   ;;  %s695_s4 = inlined_call_operand.vmem [shape: f32[8,1], index: 4, kind: output, shape index: {1}]  }
   0x1   :  { %v28_v0 = vld [vmem:[%s692_s1] sm:$0xff]  ;;  %432 = vmatprep.subr.mxu0 %v541_v2  ;;  %434 = vmatprep.mubr.msk.f32.mxu0 %vm542_vm1, %v541_v2  ;;  %v109_v3 = vld [vmem:[%s692_s1 + $0x8] sm:$0xff]  ;;  %v110_v4 = vld [vmem:[%s692_s1 + $0x10] sm:$0xff] }
   0x2   :  { %v21_v1 = vld [vmem:[%s691_s0] sm:$0xff]  ;;  %433 = vmatpush3.msra.mxu0 %v28_v0  ;;  %482 = vmatprep.subr.bf16.mxu1 %v543_v5  ;;  %v483_v6 = vpack.c.bf16 %v110_v4, %v109_v3 }
   0x3   :  { %23 = vst.msk [vmem:[#allocation2] sm:$0xff] %vm22_vm0, %v21_v1 }
   0x4   :  { %10 = vsyncpa [#allocation4], 0  ;;  %449 = vmatprep.mubr.msk.f32.mxu1 %vm542_vm1, %v541_v2  ;;  %491 = vmatprep.subr.bf16.mxu0 %v543_v5  ;;  %v111_v8 = vld [vmem:[%s692_s1 + $0x18] sm:$0xff]  ;;  %v112_v9 = vld [vmem:[%s692_s1 + $0x20] sm:$0xff]  ;;  %v29_v17 = vlaneseq  ;;  %vm119_vm2 = vcmask 392192   ;;  %vm24_vm3 = vcmask 7168  }
   0x5   :  { %484 = vmatpush3.bf16.msra.mxu1 %v483_v6  ;;  %v486_v10 = vpack.c.bf16 %v112_v9, %v111_v8  ;;  %v113_v11 = vld [vmem:[%s692_s1 + $0x28] sm:$0xff]  ;;  %v114_v12 = vld [vmem:[%s692_s1 + $0x30] sm:$0xff]  ;;  %v195_v14 = vld [vmem:[%s692_s1 + $0x38] sm:$0xff]  ;;  %25 = vst.msk [vmem:[%s695_s4] sm:$0xff] %vm24_vm3, %v541_v2  ;;  %s545_s30 = smov 112   ;;  %s546_s5 = smov [#allocation3]  }
   0x6   :  { %485 = vmatprep.subr.bf16.mxu1 %v543_v5  ;;  %v489_v13 = vpack.c.bf16 %v114_v12, %v113_v11  ;;  %v196_v15 = vld [vmem:[%s692_s1 + $0x40] sm:$0xff]  ;;  %v30_v18 = vshrl.u32 %v29_v17, 7  ;;  %v197_v27 = vld [vmem:[%s692_s1 + $0x48] sm:$0xff]  ;;  %v198_v28 = vld [vmem:[%s692_s1 + $0x50] sm:$0xff]  ;;  %v373_v63 = vand.u32 127, %v29_v17  ;;  %s393_s6 = sshll.u32 %s546_s5, 4  ;;  %s394_s6 = int_to_ptr.vmem [resolvable:$true] %s393_s6 }
   0x7   :  { %v492_v16 = vpack.c.bf16 %v196_v15, %v195_v14  ;;  %v27_v20 = vld [vmem:[%s693_s2] sm:$0xf]  ;;  %v495_v29 = vpack.c.bf16 %v198_v28, %v197_v27  ;;  %v199_v30 = vld [vmem:[%s692_s1 + $0x58] sm:$0xff]  ;;  %v280_v33 = vld [vmem:[%s692_s1 + $0x68] sm:$0xff]  ;;  %s517_s9 = scalar_lea.vmem %s394_s6, 128  ;;  %p522_p1 = scmp.lt.s32.totalorder %s394_s6, %s394_s6 }
   0x8   :  { %v31_v19 = vsub.s32 0, %v30_v18  ;;  %v200_v31 = vld [vmem:[%s692_s1 + $0x60] sm:$0xff]  ;;  %v281_v34 = vld [vmem:[%s692_s1 + $0x70] sm:$0xff]  ;;  %v117_v36 = vsub.s32 1, %v30_v18  ;;  %v282_v43 = vld [vmem:[%s692_s1 + $0x78] sm:$0xff]  ;;  %v203_v49 = vsub.s32 2, %v30_v18  ;;  %p518_p0 = scmp.ne.s32.totalorder %s394_s6, %s517_s9  ;;  %p523_p2 = scmp.lt.s32.totalorder %s517_s9, %s517_s9 }
   0x9   :  { %487 = vmatpush3.bf16.msra.mxu1 %v486_v10  ;;  %v498_v32 = vpack.c.bf16 %v200_v31, %v199_v30  ;;  %v501_v35 = vpack.c.bf16 %v281_v34, %v280_v33  ;;  %v283_v44 = vld [vmem:[%s692_s1 + $0x80] sm:$0xff]  ;;  %v284_v46 = vld [vmem:[%s692_s1 + $0x88] sm:$0xff]  ;;  %v285_v47 = vld [vmem:[%s692_s1 + $0x90] sm:$0xff]  ;;  %v288_v56 = vsub.s32 3, %v30_v18  ;;  %s544_s1 = smov 120   ;;  %vm375_vm4 = vcmp.eq.s32.totalorder %v373_v63, 0 }
   0xa   :  { %v593_v7 = vld [vmem:[#allocation2] sm:$0xff]  ;;  %488 = vmatprep.subr.bf16.mxu1 %v543_v5  ;;  %v32_v21 = vrot.slane %v27_v20, %v31_v19  ;;  %v118_v37 = vrot.slane %v27_v20, %v117_v36  ;;  %v504_v45 = vpack.c.bf16 %v283_v44, %v282_v43  ;;  %v507_v48 = vpack.c.bf16 %v285_v47, %v284_v46  ;;  %p524_p3 = por %p523_p2, %p522_p1 }
   0xb   :  { %435 = vmatmul.mubr.msk.f32.vlgmr.msra.gmra.mrb[0].mxu0 %vm22_vm0, %v593_v7  ;;  %v204_v50 = vrot.slane %v27_v20, %v203_v49  ;;  %v289_v57 = vrot.slane %v27_v20, %v288_v56 }
   0xc   :  { %464 = vmatprep.mubr.msk.f32.mxu0 %vm542_vm1, %v541_v2  ;;  %493 = vmatpush3.bf16.msra.mxu0 %v492_v16  ;;  %v376_v3 = vld [vmem:[%s695_s4] sm:$0xff]  ;;  %p525_p4 = pnand %p524_p3, %p518_p0 }
   0xd   :  { %490 = vmatpush3.bf16.msra.mxu1 %v489_v13  ;;  %494 = vmatprep.subr.bf16.mxu0 %v543_v5 }
   0xe   :  { %500 = vmatprep.subr.bf16.mxu1 %v543_v5 }
  0x10   :  { %496 = vmatpush3.bf16.msra.mxu0 %v495_v29 }
  0x11   :  { %497 = vmatprep.subr.bf16.mxu0 %v543_v5 }
  0x14   :  { %499 = vmatpush3.bf16.msra.mxu0 %v498_v32 }
  0xde   :  { %v103_v22 = vpop.f32.mrb[0].mxu0 }
  0xdf   :  { %v104_v23 = vadd.f32 %v103_v22, %v32_v21  ;;  %v436_v24 = vpop.f32.mrb[1].mxu0 }
  0xe1   :  { %v107_v25 = vmul.f32 0.2, %v104_v23 }
  0xe3   :  { %v108_v26 = vmax.f32 %v104_v23, %v107_v25 }
  0xe5   :  { %450 = vmatmul.mubr.msk.f32.vlgmr.msra.gmra.mrb[0].mxu1 %vm119_vm2, %v108_v26 }
  0xe6   :  { %479 = vmatprep.mubr.msk.f32.mxu1 %vm542_vm1, %v541_v2  ;;  %502 = vmatpush3.bf16.msra.mxu1 %v501_v35 }
  0xe7   :  { %503 = vmatprep.subr.bf16.mxu1 %v543_v5 }
  0xea   :  { %505 = vmatpush3.bf16.msra.mxu1 %v504_v45 }
  0xeb   :  { %506 = vmatprep.subr.bf16.mxu1 %v543_v5 }
  0xee   :  { %508 = vmatpush3.bf16.msra.mxu1 %v507_v48 }
 0x1b8   :  { %v189_v38 = vpop.f32.mrb[0].mxu1 }
 0x1b9   :  { %v190_v39 = vadd.f32 %v189_v38, %v118_v37  ;;  %v451_v40 = vpop.f32.mrb[1].mxu1 }
 0x1bb   :  { %v193_v41 = vmul.f32 0.2, %v190_v39 }
 0x1bd   :  { %v194_v42 = vmax.f32 %v190_v39, %v193_v41 }
 0x1bf   :  { %465 = vmatmul.mubr.msk.f32.vlgmr.msra.gmra.mrb[2].mxu0 %vm119_vm2, %v194_v42 }
 0x292   :  { %v274_v51 = vpop.f32.mrb[2].mxu0 }
 0x293   :  { %v275_v52 = vadd.f32 %v274_v51, %v204_v50  ;;  %v466_v53 = vpop.f32.mrb[3].mxu0 }
 0x295   :  { %v278_v54 = vmul.f32 0.2, %v275_v52 }
 0x297   :  { %v279_v55 = vmax.f32 %v275_v52, %v278_v54 }
 0x299   :  { %480 = vmatmul.mubr.msk.f32.vlgmr.msra.gmra.mrb[2].mxu1 %vm119_vm2, %v279_v55 }
 0x36c   :  { %v359_v58 = vpop.f32.mrb[2].mxu1 }
 0x36d   :  { %v360_v59 = vadd.f32 %v359_v58, %v289_v57  ;;  %v481_v60 = vpop.f32.mrb[3].mxu1 }
 0x36f   :  { %367 = vrot.lane.b32.xlu0 %v360_v59, %s544_s1  ;;  %v363_v61 = vmul.f32 1.442695, %v360_v59 }
 0x371   :  { %515 = vpow2.f32 %v363_v61 }
 0x373   :  { %377 = vrot.lane.b32.xlu0 %v360_v59, %s545_s30 }
 0x37b   :  { %v516_v62 = vpop.eup %515 }
 0x37c   :  { %v365_v0 = vmul.f32 %v516_v62, %v593_v7 }
 0x3e1   :  { %v368_v1 = vpop.permute.xlu0 %367 }
 0x3e2   :  { %v370_v2 = vadd.f32 %v368_v1, %v365_v0 }
 0x3e4   :  { %371 = vst.msk [vmem:[#allocation2] sm:$0xff] %vm22_vm0, %v370_v2  ;;  %386 = vst.msk [vmem:[#allocation3] sm:$0xff] %vm22_vm0, %v370_v2 }
 0x3e5   :  { %v378_v4 = vpop.permute.xlu0 %377 }
 0x3e6   :  { %528 = shalt.err (!%p525_p4)
}
 0x3e7   :  { %s529_s12 = scalar_lea.hbm %s694_s3, 128 }
 0x3e8   :  { %p530_p5 = scmp.ne.s32.totalorder %s694_s3, %s529_s12  ;;  %p533_p6 = scmp.lt.u32.totalorder %s529_s12, %s694_s3 }
 0x3ea   :  { %p535_p7 = pnand %p533_p6, %p530_p5 }
 0x3ec   :  { %538 = shalt.err (!%p535_p7)
}
 0x3ed   :  { %396 = dma.vmem_to_hbm [thread:$0]  %s394_s6, 128, %s694_s3, [#allocation4]   ;;  %v380_v5 = vsel %vm375_vm4, %v378_v4, %v376_v3 }
 0x3ee   :  { %382 = vst.msk [vmem:[%s695_s4] sm:$0xff] %vm24_vm3, %v380_v5 }
 0x3ef   :  { %539 = dma.done.wait [#allocation4], 128  }
 0x3f0   :  { %540 = vsyncadd [#allocation4], 4294967168 }
 0x3f1   :  { %404 = vsyncpa [#allocation4], 1 }

</bundles_post_ra>
